<compile_context>
chip_gen: v6e
topology: v6e:2x2x1
jax: 0.10.0
libtpu: 0.0.40
codegen_flags: <defaults>
</compile_context>

<pallas_src>
import functools

import jax
import jax.numpy as jnp
from jax.experimental import pallas as pl
from jax.experimental.pallas import tpu as pltpu


GROUP = 8  # one full sublane group per store -> unmasked (8, 128k) tile stores


def embedding_stem_kernel(idx_ref, tok_hbm, pos_ref, out_ref, rows_vmem, sems,
                          *, group, seq_len):
    # idx_ref  : SMEM (B*T,) int32   flattened token ids (scalar prefetch)
    # tok_hbm  : HBM  (V, E)         full token-embedding table (never in VMEM)
    # pos_ref  : VMEM (group, E)     positional rows for this token group
    # out_ref  : VMEM (group, E)     output slab for this (batch, group) tile
    # rows_vmem: VMEM (group, E)     gathered token-embedding rows (scratch)
    # sems     : DMA semaphores (group,)
    b = pl.program_id(0)
    g = pl.program_id(1)
    base = b * seq_len + g * group

    # Issue one row-gather DMA per token in the group (HBM -> VMEM), then wait.
    copies = []
    for r in range(group):  # static, tiny (group == 8)
        tok_id = idx_ref[base + r]
        cp = pltpu.make_async_copy(
            tok_hbm.at[pl.ds(tok_id, 1), :],   # (1, E) row in HBM
            rows_vmem.at[pl.ds(r, 1), :],      # (1, E) row in VMEM scratch
            sems.at[r],
        )
        cp.start()
        copies.append(cp)
    for cp in copies:
        cp.wait()

    # Single vectorized add + one full-tile, lane-dense store for the group.
    out_ref[...] = rows_vmem[...] + pos_ref[...]
    # TODO(synk): training-mode dropout (embd_pdrop) omitted; eval-mode dropout
    # is identity (would need pltpu.prng_seed + pltpu.prng_random_bits + mask).


def embedding_stem(idx, tok_emb, pos_emb, *, group=GROUP):
    """idx: (B, T) int ids; tok_emb: (V, E); pos_emb: (block_size, E) -> (B, T, E)."""
    B, T = idx.shape
    V, E = tok_emb.shape
    assert T <= pos_emb.shape[0], (
        f"Cannot forward sequence of length {T}, block size is only {pos_emb.shape[0]}"
    )
    assert T % group == 0, f"sequence length {T} must be a multiple of {group}"

    # Lane-dense output: pad the embedding dim up to a multiple of 128 if needed
    # (no-op for real GPT sizes, where n_embd is already a multiple of 128).
    e_pad = ((E + 127) // 128) * 128
    if e_pad != E:
        tok_emb = jnp.pad(tok_emb, ((0, 0), (0, e_pad - E)))
        pos_emb = jnp.pad(pos_emb, ((0, 0), (0, e_pad - E)))

    # Flatten + clamp ids (OOB ids would otherwise silently gather garbage).
    idx_flat = jnp.clip(idx.astype(jnp.int32).reshape(-1), 0, V - 1)

    kernel = functools.partial(embedding_stem_kernel, group=group, seq_len=T)

    out = pl.pallas_call(
        kernel,
        out_shape=jax.ShapeDtypeStruct((B, T, e_pad), tok_emb.dtype),
        grid_spec=pltpu.PrefetchScalarGridSpec(
            num_scalar_prefetch=1,           # idx lives in SMEM
            grid=(B, T // group),            # (batch, token-group)
            in_specs=[
                # token-embedding table stays in HBM; rows are DMA-gathered
                pl.BlockSpec(memory_space=pl.ANY),
                # positional rows for the current token group
                pl.BlockSpec((group, e_pad), lambda b, g, idx_ref: (g, 0)),
            ],
            # squeeze the batch dim: kernel sees a (group, E) output slab
            out_specs=pl.BlockSpec((None, group, e_pad),
                                   lambda b, g, idx_ref: (b, g, 0)),
            scratch_shapes=[
                pltpu.VMEM((group, e_pad), tok_emb.dtype),   # gathered rows
                pltpu.SemaphoreType.DMA((group,)),           # one sem per row DMA
            ],
        ),
        compiler_params=pltpu.CompilerParams(
            dimension_semantics=("parallel", "parallel"),
        ),
    )(idx_flat, tok_emb, pos_emb)

    return out[..., :E] if e_pad != E else out


if __name__ == "__main__":
    # Small synthetic GPTConfig-like sizes: vocab=128, n_embd=128, block_size=16
    # (E chosen as a multiple of 128 so output stores are lane-dense).
    V, E, BLOCK_SIZE = 128, 128, 16
    B, T = 2, 8

    key = jax.random.PRNGKey(0)
    k_tok, k_pos, k_idx = jax.random.split(key, 3)

    # nn.Embedding init ~ N(0, 0.02) after GPT._init_weights; pos_emb is zeros in
    # the module — use a small perturbation so the addition path is exercised.
    tok_table = 0.02 * jax.random.normal(k_tok, (V, E), dtype=jnp.float32)
    pos_table = 0.01 * jax.random.normal(k_pos, (BLOCK_SIZE, E), dtype=jnp.float32)
    idx = jax.random.randint(k_idx, (B, T), 0, V, dtype=jnp.int32)

    out = embedding_stem(idx, tok_table, pos_table)
    out = jax.block_until_ready(out)

    # Pure-JAX reference (eval-mode dropout == identity).
    ref = tok_table[idx] + pos_table[:T][None, :, :]
    assert out.shape == (B, T, E)
    assert jnp.allclose(out, ref, atol=1e-6), "mismatch vs reference"

    print("KERNEL_OK")
</pallas_src>

<mosaic_0001>
module attributes {stable_mosaic.version = 11 : i64} {
  func.func @embedding_stem_kernel(%arg0: i32, %arg1: i32, %arg2: memref<16xi32, #tpu.memory_space<smem>>, %arg3: memref<128x128xf32, #tpu.memory_space<any>>, %arg4: memref<8x128xf32, #tpu.memory_space<vmem>>, %arg5: memref<1x8x128xf32, #tpu.memory_space<vmem>>, %arg6: memref<8x128xf32, #tpu.memory_space<vmem>>, %arg7: memref<8x!tpu.dma_semaphore, #tpu.memory_space<semaphore_mem>>) attributes {dimension_semantics = [#tpu.dimension_semantics<parallel>, #tpu.dimension_semantics<parallel>], iteration_bounds = array<i64: 2, 1>, scalar_prefetch = 1 : i64, scratch_operands = 2 : i64, tpu.core_type = #tpu.core_type<tc>, window_params = [{}, {transform_indices = @transform_1, window_bounds = array<i64: 8, 128>}, {transform_indices = @transform_2, window_bounds = array<i64: 1, 8, 128>}]} {
    %c8_i32 = arith.constant 8 : i32
    %0 = arith.muli %arg0, %c8_i32 : i32
    %c8_i32_0 = arith.constant 8 : i32
    %1 = arith.muli %arg1, %c8_i32_0 : i32
    %2 = arith.addi %0, %1 : i32
    %c0_i32 = arith.constant 0 : i32
    %3 = arith.addi %2, %c0_i32 : i32
    %4 = arith.index_cast %3 : i32 to index
    %5 = memref.load %arg2[%4] : memref<16xi32, #tpu.memory_space<smem>>
    %c0_i32_1 = arith.constant 0 : i32
    %c0_i32_2 = arith.constant 0 : i32
    %6 = tpu.memref_slice %arg3[%5, %c0_i32_2] : memref<128x128xf32, #tpu.memory_space<any>> -> memref<1x128xf32, #tpu.memory_space<any>>
    %c0_i32_3 = arith.constant 0 : i32
    %c0_i32_4 = arith.constant 0 : i32
    %7 = tpu.memref_slice %arg6[%c0_i32_3, %c0_i32_4] : memref<8x128xf32, #tpu.memory_space<vmem>> -> memref<1x128xf32, #tpu.memory_space<vmem>>
    %8 = tpu.memref_slice %arg7[%c0_i32_1] : memref<8x!tpu.dma_semaphore, #tpu.memory_space<semaphore_mem>> -> memref<1x!tpu.dma_semaphore, #tpu.memory_space<semaphore_mem>>
    %9 = tpu.memref_squeeze %8 : memref<1x!tpu.dma_semaphore, #tpu.memory_space<semaphore_mem>> -> memref<!tpu.dma_semaphore, #tpu.memory_space<semaphore_mem>>
    tpu.enqueue_dma source(%6 : memref<1x128xf32, #tpu.memory_space<any>>) target(%7 : memref<1x128xf32, #tpu.memory_space<vmem>>) target_semaphore(%9 : memref<!tpu.dma_semaphore, #tpu.memory_space<semaphore_mem>>)
    %c1_i32 = arith.constant 1 : i32
    %10 = arith.addi %2, %c1_i32 : i32
    %11 = arith.index_cast %10 : i32 to index
    %12 = memref.load %arg2[%11] : memref<16xi32, #tpu.memory_space<smem>>
    %c1_i32_5 = arith.constant 1 : i32
    %c0_i32_6 = arith.constant 0 : i32
    %13 = tpu.memref_slice %arg3[%12, %c0_i32_6] : memref<128x128xf32, #tpu.memory_space<any>> -> memref<1x128xf32, #tpu.memory_space<any>>
    %c1_i32_7 = arith.constant 1 : i32
    %c0_i32_8 = arith.constant 0 : i32
    %14 = tpu.memref_slice %arg6[%c1_i32_7, %c0_i32_8] : memref<8x128xf32, #tpu.memory_space<vmem>> -> memref<1x128xf32, #tpu.memory_space<vmem>>
    %15 = tpu.memref_slice %arg7[%c1_i32_5] : memref<8x!tpu.dma_semaphore, #tpu.memory_space<semaphore_mem>> -> memref<1x!tpu.dma_semaphore, #tpu.memory_space<semaphore_mem>>
    %16 = tpu.memref_squeeze %15 : memref<1x!tpu.dma_semaphore, #tpu.memory_space<semaphore_mem>> -> memref<!tpu.dma_semaphore, #tpu.memory_space<semaphore_mem>>
    tpu.enqueue_dma source(%13 : memref<1x128xf32, #tpu.memory_space<any>>) target(%14 : memref<1x128xf32, #tpu.memory_space<vmem>>) target_semaphore(%16 : memref<!tpu.dma_semaphore, #tpu.memory_space<semaphore_mem>>)
    %c2_i32 = arith.constant 2 : i32
    %17 = arith.addi %2, %c2_i32 : i32
    %18 = arith.index_cast %17 : i32 to index
    %19 = memref.load %arg2[%18] : memref<16xi32, #tpu.memory_space<smem>>
    %c2_i32_9 = arith.constant 2 : i32
    %c0_i32_10 = arith.constant 0 : i32
    %20 = tpu.memref_slice %arg3[%19, %c0_i32_10] : memref<128x128xf32, #tpu.memory_space<any>> -> memref<1x128xf32, #tpu.memory_space<any>>
    %c2_i32_11 = arith.constant 2 : i32
    %c0_i32_12 = arith.constant 0 : i32
    %21 = tpu.memref_slice %arg6[%c2_i32_11, %c0_i32_12] : memref<8x128xf32, #tpu.memory_space<vmem>> -> memref<1x128xf32, #tpu.memory_space<vmem>>
    %22 = tpu.memref_slice %arg7[%c2_i32_9] : memref<8x!tpu.dma_semaphore, #tpu.memory_space<semaphore_mem>> -> memref<1x!tpu.dma_semaphore, #tpu.memory_space<semaphore_mem>>
    %23 = tpu.memref_squeeze %22 : memref<1x!tpu.dma_semaphore, #tpu.memory_space<semaphore_mem>> -> memref<!tpu.dma_semaphore, #tpu.memory_space<semaphore_mem>>
    tpu.enqueue_dma source(%20 : memref<1x128xf32, #tpu.memory_space<any>>) target(%21 : memref<1x128xf32, #tpu.memory_space<vmem>>) target_semaphore(%23 : memref<!tpu.dma_semaphore, #tpu.memory_space<semaphore_mem>>)
    %c3_i32 = arith.constant 3 : i32
    %24 = arith.addi %2, %c3_i32 : i32
    %25 = arith.index_cast %24 : i32 to index
    %26 = memref.load %arg2[%25] : memref<16xi32, #tpu.memory_space<smem>>
    %c3_i32_13 = arith.constant 3 : i32
    %c0_i32_14 = arith.constant 0 : i32
    %27 = tpu.memref_slice %arg3[%26, %c0_i32_14] : memref<128x128xf32, #tpu.memory_space<any>> -> memref<1x128xf32, #tpu.memory_space<any>>
    %c3_i32_15 = arith.constant 3 : i32
    %c0_i32_16 = arith.constant 0 : i32
    %28 = tpu.memref_slice %arg6[%c3_i32_15, %c0_i32_16] : memref<8x128xf32, #tpu.memory_space<vmem>> -> memref<1x128xf32, #tpu.memory_space<vmem>>
    %29 = tpu.memref_slice %arg7[%c3_i32_13] : memref<8x!tpu.dma_semaphore, #tpu.memory_space<semaphore_mem>> -> memref<1x!tpu.dma_semaphore, #tpu.memory_space<semaphore_mem>>
    %30 = tpu.memref_squeeze %29 : memref<1x!tpu.dma_semaphore, #tpu.memory_space<semaphore_mem>> -> memref<!tpu.dma_semaphore, #tpu.memory_space<semaphore_mem>>
    tpu.enqueue_dma source(%27 : memref<1x128xf32, #tpu.memory_space<any>>) target(%28 : memref<1x128xf32, #tpu.memory_space<vmem>>) target_semaphore(%30 : memref<!tpu.dma_semaphore, #tpu.memory_space<semaphore_mem>>)
    %c4_i32 = arith.constant 4 : i32
    %31 = arith.addi %2, %c4_i32 : i32
    %32 = arith.index_cast %31 : i32 to index
    %33 = memref.load %arg2[%32] : memref<16xi32, #tpu.memory_space<smem>>
    %c4_i32_17 = arith.constant 4 : i32
    %c0_i32_18 = arith.constant 0 : i32
    %34 = tpu.memref_slice %arg3[%33, %c0_i32_18] : memref<128x128xf32, #tpu.memory_space<any>> -> memref<1x128xf32, #tpu.memory_space<any>>
    %c4_i32_19 = arith.constant 4 : i32
    %c0_i32_20 = arith.constant 0 : i32
    %35 = tpu.memref_slice %arg6[%c4_i32_19, %c0_i32_20] : memref<8x128xf32, #tpu.memory_space<vmem>> -> memref<1x128xf32, #tpu.memory_space<vmem>>
    %36 = tpu.memref_slice %arg7[%c4_i32_17] : memref<8x!tpu.dma_semaphore, #tpu.memory_space<semaphore_mem>> -> memref<1x!tpu.dma_semaphore, #tpu.memory_space<semaphore_mem>>
    %37 = tpu.memref_squeeze %36 : memref<1x!tpu.dma_semaphore, #tpu.memory_space<semaphore_mem>> -> memref<!tpu.dma_semaphore, #tpu.memory_space<semaphore_mem>>
    tpu.enqueue_dma source(%34 : memref<1x128xf32, #tpu.memory_space<any>>) target(%35 : memref<1x128xf32, #tpu.memory_space<vmem>>) target_semaphore(%37 : memref<!tpu.dma_semaphore, #tpu.memory_space<semaphore_mem>>)
    %c5_i32 = arith.constant 5 : i32
    %38 = arith.addi %2, %c5_i32 : i32
    %39 = arith.index_cast %38 : i32 to index
    %40 = memref.load %arg2[%39] : memref<16xi32, #tpu.memory_space<smem>>
    %c5_i32_21 = arith.constant 5 : i32
    %c0_i32_22 = arith.constant 0 : i32
    %41 = tpu.memref_slice %arg3[%40, %c0_i32_22] : memref<128x128xf32, #tpu.memory_space<any>> -> memref<1x128xf32, #tpu.memory_space<any>>
    %c5_i32_23 = arith.constant 5 : i32
    %c0_i32_24 = arith.constant 0 : i32
    %42 = tpu.memref_slice %arg6[%c5_i32_23, %c0_i32_24] : memref<8x128xf32, #tpu.memory_space<vmem>> -> memref<1x128xf32, #tpu.memory_space<vmem>>
    %43 = tpu.memref_slice %arg7[%c5_i32_21] : memref<8x!tpu.dma_semaphore, #tpu.memory_space<semaphore_mem>> -> memref<1x!tpu.dma_semaphore, #tpu.memory_space<semaphore_mem>>
    %44 = tpu.memref_squeeze %43 : memref<1x!tpu.dma_semaphore, #tpu.memory_space<semaphore_mem>> -> memref<!tpu.dma_semaphore, #tpu.memory_space<semaphore_mem>>
    tpu.enqueue_dma source(%41 : memref<1x128xf32, #tpu.memory_space<any>>) target(%42 : memref<1x128xf32, #tpu.memory_space<vmem>>) target_semaphore(%44 : memref<!tpu.dma_semaphore, #tpu.memory_space<semaphore_mem>>)
    %c6_i32 = arith.constant 6 : i32
    %45 = arith.addi %2, %c6_i32 : i32
    %46 = arith.index_cast %45 : i32 to index
    %47 = memref.load %arg2[%46] : memref<16xi32, #tpu.memory_space<smem>>
    %c6_i32_25 = arith.constant 6 : i32
    %c0_i32_26 = arith.constant 0 : i32
    %48 = tpu.memref_slice %arg3[%47, %c0_i32_26] : memref<128x128xf32, #tpu.memory_space<any>> -> memref<1x128xf32, #tpu.memory_space<any>>
    %c6_i32_27 = arith.constant 6 : i32
    %c0_i32_28 = arith.constant 0 : i32
    %49 = tpu.memref_slice %arg6[%c6_i32_27, %c0_i32_28] : memref<8x128xf32, #tpu.memory_space<vmem>> -> memref<1x128xf32, #tpu.memory_space<vmem>>
    %50 = tpu.memref_slice %arg7[%c6_i32_25] : memref<8x!tpu.dma_semaphore, #tpu.memory_space<semaphore_mem>> -> memref<1x!tpu.dma_semaphore, #tpu.memory_space<semaphore_mem>>
    %51 = tpu.memref_squeeze %50 : memref<1x!tpu.dma_semaphore, #tpu.memory_space<semaphore_mem>> -> memref<!tpu.dma_semaphore, #tpu.memory_space<semaphore_mem>>
    tpu.enqueue_dma source(%48 : memref<1x128xf32, #tpu.memory_space<any>>) target(%49 : memref<1x128xf32, #tpu.memory_space<vmem>>) target_semaphore(%51 : memref<!tpu.dma_semaphore, #tpu.memory_space<semaphore_mem>>)
    %c7_i32 = arith.constant 7 : i32
    %52 = arith.addi %2, %c7_i32 : i32
    %53 = arith.index_cast %52 : i32 to index
    %54 = memref.load %arg2[%53] : memref<16xi32, #tpu.memory_space<smem>>
    %c7_i32_29 = arith.constant 7 : i32
    %c0_i32_30 = arith.constant 0 : i32
    %55 = tpu.memref_slice %arg3[%54, %c0_i32_30] : memref<128x128xf32, #tpu.memory_space<any>> -> memref<1x128xf32, #tpu.memory_space<any>>
    %c7_i32_31 = arith.constant 7 : i32
    %c0_i32_32 = arith.constant 0 : i32
    %56 = tpu.memref_slice %arg6[%c7_i32_31, %c0_i32_32] : memref<8x128xf32, #tpu.memory_space<vmem>> -> memref<1x128xf32, #tpu.memory_space<vmem>>
    %57 = tpu.memref_slice %arg7[%c7_i32_29] : memref<8x!tpu.dma_semaphore, #tpu.memory_space<semaphore_mem>> -> memref<1x!tpu.dma_semaphore, #tpu.memory_space<semaphore_mem>>
    %58 = tpu.memref_squeeze %57 : memref<1x!tpu.dma_semaphore, #tpu.memory_space<semaphore_mem>> -> memref<!tpu.dma_semaphore, #tpu.memory_space<semaphore_mem>>
    tpu.enqueue_dma source(%55 : memref<1x128xf32, #tpu.memory_space<any>>) target(%56 : memref<1x128xf32, #tpu.memory_space<vmem>>) target_semaphore(%58 : memref<!tpu.dma_semaphore, #tpu.memory_space<semaphore_mem>>)
    %c0_i32_33 = arith.constant 0 : i32
    %c0_i32_34 = arith.constant 0 : i32
    %59 = tpu.memref_slice %arg3[%5, %c0_i32_34] : memref<128x128xf32, #tpu.memory_space<any>> -> memref<1x128xf32, #tpu.memory_space<any>>
    %c0_i32_35 = arith.constant 0 : i32
    %c0_i32_36 = arith.constant 0 : i32
    %60 = tpu.memref_slice %arg6[%c0_i32_35, %c0_i32_36] : memref<8x128xf32, #tpu.memory_space<vmem>> -> memref<1x128xf32, #tpu.memory_space<vmem>>
    %61 = tpu.memref_slice %arg7[%c0_i32_33] : memref<8x!tpu.dma_semaphore, #tpu.memory_space<semaphore_mem>> -> memref<1x!tpu.dma_semaphore, #tpu.memory_space<semaphore_mem>>
    %62 = tpu.memref_squeeze %61 : memref<1x!tpu.dma_semaphore, #tpu.memory_space<semaphore_mem>> -> memref<!tpu.dma_semaphore, #tpu.memory_space<semaphore_mem>>
    tpu.wait_dma2 semaphore(%62 : memref<!tpu.dma_semaphore, #tpu.memory_space<semaphore_mem>>) src(%59 : memref<1x128xf32, #tpu.memory_space<any>>) dst(%60 : memref<1x128xf32, #tpu.memory_space<vmem>>)
    %c1_i32_37 = arith.constant 1 : i32
    %c0_i32_38 = arith.constant 0 : i32
    %63 = tpu.memref_slice %arg3[%12, %c0_i32_38] : memref<128x128xf32, #tpu.memory_space<any>> -> memref<1x128xf32, #tpu.memory_space<any>>
    %c1_i32_39 = arith.constant 1 : i32
    %c0_i32_40 = arith.constant 0 : i32
    %64 = tpu.memref_slice %arg6[%c1_i32_39, %c0_i32_40] : memref<8x128xf32, #tpu.memory_space<vmem>> -> memref<1x128xf32, #tpu.memory_space<vmem>>
    %65 = tpu.memref_slice %arg7[%c1_i32_37] : memref<8x!tpu.dma_semaphore, #tpu.memory_space<semaphore_mem>> -> memref<1x!tpu.dma_semaphore, #tpu.memory_space<semaphore_mem>>
    %66 = tpu.memref_squeeze %65 : memref<1x!tpu.dma_semaphore, #tpu.memory_space<semaphore_mem>> -> memref<!tpu.dma_semaphore, #tpu.memory_space<semaphore_mem>>
    tpu.wait_dma2 semaphore(%66 : memref<!tpu.dma_semaphore, #tpu.memory_space<semaphore_mem>>) src(%63 : memref<1x128xf32, #tpu.memory_space<any>>) dst(%64 : memref<1x128xf32, #tpu.memory_space<vmem>>)
    %c2_i32_41 = arith.constant 2 : i32
    %c0_i32_42 = arith.constant 0 : i32
    %67 = tpu.memref_slice %arg3[%19, %c0_i32_42] : memref<128x128xf32, #tpu.memory_space<any>> -> memref<1x128xf32, #tpu.memory_space<any>>
    %c2_i32_43 = arith.constant 2 : i32
    %c0_i32_44 = arith.constant 0 : i32
    %68 = tpu.memref_slice %arg6[%c2_i32_43, %c0_i32_44] : memref<8x128xf32, #tpu.memory_space<vmem>> -> memref<1x128xf32, #tpu.memory_space<vmem>>
    %69 = tpu.memref_slice %arg7[%c2_i32_41] : memref<8x!tpu.dma_semaphore, #tpu.memory_space<semaphore_mem>> -> memref<1x!tpu.dma_semaphore, #tpu.memory_space<semaphore_mem>>
    %70 = tpu.memref_squeeze %69 : memref<1x!tpu.dma_semaphore, #tpu.memory_space<semaphore_mem>> -> memref<!tpu.dma_semaphore, #tpu.memory_space<semaphore_mem>>
    tpu.wait_dma2 semaphore(%70 : memref<!tpu.dma_semaphore, #tpu.memory_space<semaphore_mem>>) src(%67 : memref<1x128xf32, #tpu.memory_space<any>>) dst(%68 : memref<1x128xf32, #tpu.memory_space<vmem>>)
    %c3_i32_45 = arith.constant 3 : i32
    %c0_i32_46 = arith.constant 0 : i32
    %71 = tpu.memref_slice %arg3[%26, %c0_i32_46] : memref<128x128xf32, #tpu.memory_space<any>> -> memref<1x128xf32, #tpu.memory_space<any>>
    %c3_i32_47 = arith.constant 3 : i32
    %c0_i32_48 = arith.constant 0 : i32
    %72 = tpu.memref_slice %arg6[%c3_i32_47, %c0_i32_48] : memref<8x128xf32, #tpu.memory_space<vmem>> -> memref<1x128xf32, #tpu.memory_space<vmem>>
    %73 = tpu.memref_slice %arg7[%c3_i32_45] : memref<8x!tpu.dma_semaphore, #tpu.memory_space<semaphore_mem>> -> memref<1x!tpu.dma_semaphore, #tpu.memory_space<semaphore_mem>>
    %74 = tpu.memref_squeeze %73 : memref<1x!tpu.dma_semaphore, #tpu.memory_space<semaphore_mem>> -> memref<!tpu.dma_semaphore, #tpu.memory_space<semaphore_mem>>
    tpu.wait_dma2 semaphore(%74 : memref<!tpu.dma_semaphore, #tpu.memory_space<semaphore_mem>>) src(%71 : memref<1x128xf32, #tpu.memory_space<any>>) dst(%72 : memref<1x128xf32, #tpu.memory_space<vmem>>)
    %c4_i32_49 = arith.constant 4 : i32
    %c0_i32_50 = arith.constant 0 : i32
    %75 = tpu.memref_slice %arg3[%33, %c0_i32_50] : memref<128x128xf32, #tpu.memory_space<any>> -> memref<1x128xf32, #tpu.memory_space<any>>
    %c4_i32_51 = arith.constant 4 : i32
    %c0_i32_52 = arith.constant 0 : i32
    %76 = tpu.memref_slice %arg6[%c4_i32_51, %c0_i32_52] : memref<8x128xf32, #tpu.memory_space<vmem>> -> memref<1x128xf32, #tpu.memory_space<vmem>>
    %77 = tpu.memref_slice %arg7[%c4_i32_49] : memref<8x!tpu.dma_semaphore, #tpu.memory_space<semaphore_mem>> -> memref<1x!tpu.dma_semaphore, #tpu.memory_space<semaphore_mem>>
    %78 = tpu.memref_squeeze %77 : memref<1x!tpu.dma_semaphore, #tpu.memory_space<semaphore_mem>> -> memref<!tpu.dma_semaphore, #tpu.memory_space<semaphore_mem>>
    tpu.wait_dma2 semaphore(%78 : memref<!tpu.dma_semaphore, #tpu.memory_space<semaphore_mem>>) src(%75 : memref<1x128xf32, #tpu.memory_space<any>>) dst(%76 : memref<1x128xf32, #tpu.memory_space<vmem>>)
    %c5_i32_53 = arith.constant 5 : i32
    %c0_i32_54 = arith.constant 0 : i32
    %79 = tpu.memref_slice %arg3[%40, %c0_i32_54] : memref<128x128xf32, #tpu.memory_space<any>> -> memref<1x128xf32, #tpu.memory_space<any>>
    %c5_i32_55 = arith.constant 5 : i32
    %c0_i32_56 = arith.constant 0 : i32
    %80 = tpu.memref_slice %arg6[%c5_i32_55, %c0_i32_56] : memref<8x128xf32, #tpu.memory_space<vmem>> -> memref<1x128xf32, #tpu.memory_space<vmem>>
    %81 = tpu.memref_slice %arg7[%c5_i32_53] : memref<8x!tpu.dma_semaphore, #tpu.memory_space<semaphore_mem>> -> memref<1x!tpu.dma_semaphore, #tpu.memory_space<semaphore_mem>>
    %82 = tpu.memref_squeeze %81 : memref<1x!tpu.dma_semaphore, #tpu.memory_space<semaphore_mem>> -> memref<!tpu.dma_semaphore, #tpu.memory_space<semaphore_mem>>
    tpu.wait_dma2 semaphore(%82 : memref<!tpu.dma_semaphore, #tpu.memory_space<semaphore_mem>>) src(%79 : memref<1x128xf32, #tpu.memory_space<any>>) dst(%80 : memref<1x128xf32, #tpu.memory_space<vmem>>)
    %c6_i32_57 = arith.constant 6 : i32
    %c0_i32_58 = arith.constant 0 : i32
    %83 = tpu.memref_slice %arg3[%47, %c0_i32_58] : memref<128x128xf32, #tpu.memory_space<any>> -> memref<1x128xf32, #tpu.memory_space<any>>
    %c6_i32_59 = arith.constant 6 : i32
    %c0_i32_60 = arith.constant 0 : i32
    %84 = tpu.memref_slice %arg6[%c6_i32_59, %c0_i32_60] : memref<8x128xf32, #tpu.memory_space<vmem>> -> memref<1x128xf32, #tpu.memory_space<vmem>>
    %85 = tpu.memref_slice %arg7[%c6_i32_57] : memref<8x!tpu.dma_semaphore, #tpu.memory_space<semaphore_mem>> -> memref<1x!tpu.dma_semaphore, #tpu.memory_space<semaphore_mem>>
    %86 = tpu.memref_squeeze %85 : memref<1x!tpu.dma_semaphore, #tpu.memory_space<semaphore_mem>> -> memref<!tpu.dma_semaphore, #tpu.memory_space<semaphore_mem>>
    tpu.wait_dma2 semaphore(%86 : memref<!tpu.dma_semaphore, #tpu.memory_space<semaphore_mem>>) src(%83 : memref<1x128xf32, #tpu.memory_space<any>>) dst(%84 : memref<1x128xf32, #tpu.memory_space<vmem>>)
    %c7_i32_61 = arith.constant 7 : i32
    %c0_i32_62 = arith.constant 0 : i32
    %87 = tpu.memref_slice %arg3[%54, %c0_i32_62] : memref<128x128xf32, #tpu.memory_space<any>> -> memref<1x128xf32, #tpu.memory_space<any>>
    %c7_i32_63 = arith.constant 7 : i32
    %c0_i32_64 = arith.constant 0 : i32
    %88 = tpu.memref_slice %arg6[%c7_i32_63, %c0_i32_64] : memref<8x128xf32, #tpu.memory_space<vmem>> -> memref<1x128xf32, #tpu.memory_space<vmem>>
    %89 = tpu.memref_slice %arg7[%c7_i32_61] : memref<8x!tpu.dma_semaphore, #tpu.memory_space<semaphore_mem>> -> memref<1x!tpu.dma_semaphore, #tpu.memory_space<semaphore_mem>>
    %90 = tpu.memref_squeeze %89 : memref<1x!tpu.dma_semaphore, #tpu.memory_space<semaphore_mem>> -> memref<!tpu.dma_semaphore, #tpu.memory_space<semaphore_mem>>
    tpu.wait_dma2 semaphore(%90 : memref<!tpu.dma_semaphore, #tpu.memory_space<semaphore_mem>>) src(%87 : memref<1x128xf32, #tpu.memory_space<any>>) dst(%88 : memref<1x128xf32, #tpu.memory_space<vmem>>)
    %c0 = arith.constant 0 : index
    %c0_65 = arith.constant 0 : index
    %91 = vector.load %arg6[%c0, %c0_65] : memref<8x128xf32, #tpu.memory_space<vmem>>, vector<8x128xf32>
    %c0_66 = arith.constant 0 : index
    %c0_67 = arith.constant 0 : index
    %92 = vector.load %arg4[%c0_66, %c0_67] : memref<8x128xf32, #tpu.memory_space<vmem>>, vector<8x128xf32>
    %93 = arith.addf %91, %92 : vector<8x128xf32>
    %c0_68 = arith.constant 0 : index
    %c0_69 = arith.constant 0 : index
    %c0_70 = arith.constant 0 : index
    %94 = vector.load %arg5[%c0_68, %c0_69, %c0_70] : memref<1x8x128xf32, #tpu.memory_space<vmem>>, vector<1x8x128xf32>
    %95 = vector.shape_cast %94 : vector<1x8x128xf32> to vector<8x128xf32>
    %96 = vector.shape_cast %93 : vector<8x128xf32> to vector<1x8x128xf32>
    tpu.vector_store %arg5[%c0_68, %c0_69, %c0_70], %96 {strides = array<i32>} : memref<1x8x128xf32, #tpu.memory_space<vmem>>, vector<1x8x128xf32>,
    return
  }
  func.func @transform_1(%arg0: i32, %arg1: i32, %arg2: memref<16xi32, #tpu.memory_space<smem>>) -> (i32, i32) {
    %c0_i32 = arith.constant 0 : i32
    %c0_i32_0 = arith.constant 0 : i32
    return %arg1, %c0_i32 : i32, i32
  }
  func.func @transform_2(%arg0: i32, %arg1: i32, %arg2: memref<16xi32, #tpu.memory_space<smem>>) -> (i32, i32, i32) {
    %c0_i32 = arith.constant 0 : i32
    %c0_i32_0 = arith.constant 0 : i32
    return %arg0, %arg1, %c0_i32 : i32, i32, i32
  }
}

</mosaic_0001>

<bundles_post_ra>
// kernel: tpu_custom_call.1
= control target key start
LH: loop header
LB: loop body
LE: loop exit
PB: predicated region body
PF: predicated region fallthrough
CT: control target
= control target key end

     0   :  { %s861_s12 = smov [#allocation5]   ;;  %s1141_s0 = inlined_call_operand.hbm [shape: s32[16], index: 0, kind: input, shape index: {}]   ;;  %s1142_s1 = inlined_call_operand.hbm [shape: f32[128,128], index: 1, kind: input, shape index: {}]   ;;  %s1143_s2 = inlined_call_operand.hbm [shape: f32[16,128], index: 2, kind: input, shape index: {}]   ;;  %s1144_s3 = inlined_call_operand.hbm [shape: f32[2,8,128], index: 3, kind: output, shape index: {}]  }
   0x1   :  { %1148 = sst [smem:[#allocation41_spill]] %s1143_s2 }
   0x2   :  { %9 = dma.hbm_to_smem %s1141_s0, 16, %s861_s12, [#allocation4] }
   0x3   :  { %811 = dma.done.wait [#allocation4], 16 }
   0x4   :  { %812 = vsyncadd [#allocation4], 4294967280 }
   0x5   :  { %11 = sfence }
   0x6   :  { %12 = vsyncpa [#allocation7], 0 }
   0x7   :  { %13 = vsyncpa [#allocation8], 0 }
   0x8   :  { %15 = vsyncpa [#allocation8 + $0x1], 0  ;;  %s895_s15 = smov 0   ;;  %s897_s16 = smov 0  }
   0x9   :  { %s899_s17 = smov 0   ;;  %s901_s18 = smov 0  }
   0xa   :  { %s903_s19 = smov 0   ;;  %s905_s20 = smov 0  }
   0xb LB: > { %1149 = sst [smem:[#allocation39_spill]] %s855_s19  ;;  %s448_s0 = sadd.s32 4294967295, %s859_s20   ;;  %s859_s20 = sphi %s905_s20, %s21_s20   ;;  %s855_s19 = sphi %s903_s19, %s1158_s19   ;;  %s851_s18 = sphi %s901_s18, %s1157_s18   ;;  %s847_s17 = sphi %s899_s17, %s1161_s17   ;;  %s843_s16 = sphi %s897_s16, %s1160_s16   ;;  %s839_s15 = sphi %s895_s15, %s1159_s15  }
   0xc   : > { %s449_s21 = sadd.s32 4294967294, %s859_s20   ;;  %s33_s22 = sadd.s32 1, %s855_s19 }
   0xd   : > { %s68_s23 = sadd.s32 1, %s847_s17  ;;  %p35_p0 = scmp.ge.s32.totalorder %s33_s22, 2 }
   0xe   : > { %p78_p1 = scmp.ne.s32.totalorder %s847_s17, %s843_s16  ;;  %p79_p2 = scmp.eq.s32.totalorder %s448_s0, 1 }
   0xf   : > { %p84_p3 = scmp.ne.s32.totalorder %s843_s16, %s839_s15  ;;  %s1163_s22 = smov (%p35_p0, %s33_s22), 0 }
  0x10   : > { %1150 = sst [smem:[#allocation40_spill]] %s1163_s22  ;;  %p935_p4 = por %p79_p2, %p78_p1 }
  0x11   : > { %p85_p5 = scmp.eq.s32.totalorder %s449_s21, 1  ;;  %s63_s25 = ssub.s32 %s855_s19, %s1163_s22 }
  0x12   : > { %p450_p6 = scmp.ge.s32.totalorder %s859_s20, 1  ;;  %p66_p7 = scmp.eq.s32.totalorder %s63_s25, 0 }
  0x13   : > { %p942_p8 = por %p85_p5, %p84_p3  ;;  %p92_p9 = scmp.lt.s32.totalorder %s859_s20, 3 }
  0x14   : > { %s948_s27 = scalar_select %p66_p7, %s847_s17, %s68_s23  }
  0x15   : > { %p950_p10 = pnand %p450_p6, %p92_p9  ;;  %p954_p11 = scmp.eq.s32.totalorder %s448_s0, 0 }
  0x16   : > { %s862_s30 = smov [#allocation6]  }
  0x17   : > { %p482_p12 = pneg %p950_p10  ;;  %s107_s4 = sshll.u32 %s862_s30, 4  ;;  %s108_s4 = int_to_ptr.vmem [resolvable:$true] %s107_s4 }
  0x18   : > { %s570_s5 = scalar_lea.vmem %s108_s4, 128  ;;  %p578_p5 = scmp.lt.s32.totalorder %s108_s4, %s108_s4 }
  0x19   : > { %p483_p13 = pnand %p954_p11, %p482_p12  ;;  %p571_p1 = scmp.ne.s32.totalorder %s108_s4, %s570_s5 }
  0x1a   : > { %p579_p6 = scmp.lt.s32.totalorder %s570_s5, %s570_s5 }
  0x1b   : > { %p561_p0 = pneg %p483_p13 }
  0x1c   : > { %p580_p7 = por %p579_p6, %p578_p5 }
  0x1d   : > { %p573_p2 = pnand %p571_p1, %p561_p0 }
  0x1f   : > { %p574_p3 = pneg %p573_p2 }
  0x21   : > { %p581_p9 = pnand %p580_p7, %p574_p3 }
  0x23   : > { %584 = shalt.err (!%p581_p9)
}
  0x24   : > { %s1155_s2 = sld [smem:[#allocation41_spill]] }
  0x26   : > { %120 = sbr.rel (%p950_p10) target bundleno = 249 (0xf9), region = 24 }
  0x2a   : > { %485 = dma.hbm_to_vmem [thread:$0]  (!%p483_p13), %s1155_s2, 128, %s108_s4, [#allocation7]  }
  0x2b   : > { %814 = dma.done.wait (%p954_p11), [#allocation7], 128  }
  0x2c   : > { %816 = vsyncadd (%p954_p11), [#allocation7], 4294967168  ;;  %s1145_s8 = sand.u32 1, %s843_s16   ;;  %s973_s9 = sshll.u32 %s851_s18, 3 }
  0x2d   : > { %s977_s10 = sshll.u32 %s1145_s8, 3  ;;  %s138_s11 = sld [smem:[#allocation5 + %s973_s9]] }
  0x2e   : > { %s863_s12 = smov [#allocation2]   ;;  %s152_s14 = sadd.s32 1, %s973_s9 }
  0x2f   : > { %s148_s13 = sshll.u32 %s863_s12, 4  ;;  %s983_s0 = sld [smem:[#allocation5 + %s152_s14]]  ;;  %s981_s13 = int_to_ptr.vmem [resolvable:$true] %s148_s13 }
  0x30   : > { %s169_s21 = sadd.s32 2, %s973_s9  ;;  %s864_s23 = smov [#allocation2 + $0x1]  }
  0x31   : > { %s165_s25 = sshll.u32 %s864_s23, 4  ;;  %s986_s28 = sld [smem:[#allocation5 + %s169_s21]]  ;;  %s988_s25 = int_to_ptr.vmem [resolvable:$true] %s165_s25 }
  0x32   : > { %s996_s8 = scalar_lea.hbm %s1142_s1, 2048 }
  0x33   : > { %s456_s29 = sshll.u32 %s138_s11, 4 }
  0x34   : > { %s140_s5 = scalar_lea.hbm %s1142_s1, %s456_s29 }
  0x35   : > { %s585_s6 = scalar_lea.hbm %s140_s5, 16  ;;  %p588_p11 = scmp.lt.s32.totalorder %s140_s5, %s1142_s1 }
  0x36   : > { %p586_p10 = scmp.ne.s32.totalorder %s140_s5, %s585_s6  ;;  %p589_p12 = scmp.lt.s32.totalorder %s996_s8, %s585_s6 }
  0x38   : > { %p590_p13 = por %p589_p12, %p588_p11 }
  0x3a   : > { %p591_p0 = pnand %p590_p13, %p586_p10 }
  0x3c   : > { %594 = shalt.err (!%p591_p0)  }
  0x3d   : > { %s595_s11 = scalar_lea.vmem %s981_s13, 16  ;;  %s1005_s21 = scalar_lea.vmem %s981_s13, 128 }
  0x3e   : > { %p596_p1 = scmp.ne.s32.totalorder %s981_s13, %s595_s11  ;;  %p600_p2 = scmp.lt.s32.totalorder %s981_s13, %s981_s13 }
  0x3f   : > { %p601_p3 = scmp.lt.s32.totalorder %s1005_s21, %s595_s11 }
  0x41   : > { %p602_p5 = por %p601_p3, %p600_p2 }
  0x43   : > { %p603_p6 = pnand %p602_p5, %p596_p1 }
  0x45   : > { %606 = shalt.err (!%p603_p6)  }
  0x46   : > { %151 = dma.hbm_to_vmem [thread:$0]  %s140_s5, 16, %s981_s13, [#allocation3] }
  0x47   : > { %s457_s2 = sshll.u32 %s983_s0, 4  ;;  %s865_s23 = smov [#allocation2 + $0x2]  }
  0x48   : > { %s182_s29 = sshll.u32 %s865_s23, 4  ;;  %s155_s6 = scalar_lea.hbm %s1142_s1, %s457_s2  ;;  %s1015_s29 = int_to_ptr.vmem [resolvable:$true] %s182_s29 }
  0x49   : > { %s607_s7 = scalar_lea.hbm %s155_s6, 16  ;;  %p610_p9 = scmp.lt.s32.totalorder %s155_s6, %s1142_s1 }
  0x4a   : > { %p608_p7 = scmp.ne.s32.totalorder %s155_s6, %s607_s7  ;;  %p611_p10 = scmp.lt.s32.totalorder %s996_s8, %s607_s7 }
  0x4c   : > { %p612_p11 = por %p611_p10, %p610_p9 }
  0x4e   : > { %p613_p12 = pnand %p612_p11, %p608_p7 }
  0x50   : > { %616 = shalt.err (!%p613_p12)  }
  0x51   : > { %s617_s0 = scalar_lea.vmem %s988_s25, 16  ;;  %p622_p0 = scmp.lt.s32.totalorder %s988_s25, %s981_s13 }
  0x52   : > { %p618_p13 = scmp.ne.s32.totalorder %s988_s25, %s617_s0  ;;  %p623_p1 = scmp.lt.s32.totalorder %s1005_s21, %s617_s0 }
  0x54   : > { %p624_p2 = por %p623_p1, %p622_p0 }
  0x56   : > { %p625_p3 = pnand %p624_p2, %p618_p13 }
  0x58   : > { %628 = shalt.err (!%p625_p3)  }
  0x59   : > { %168 = dma.hbm_to_vmem [thread:$0]  %s155_s6, 16, %s988_s25, [#allocation3 + $0x1] }
  0x5a   : > { %s458_s5 = sshll.u32 %s986_s28, 4  ;;  %s186_s11 = sadd.s32 3, %s973_s9 }
  0x5b   : > { %s172_s30 = scalar_lea.hbm %s1142_s1, %s458_s5  ;;  %s187_s4 = sld [smem:[#allocation5 + %s186_s11]] }
  0x5c   : > { %s629_s7 = scalar_lea.hbm %s172_s30, 16  ;;  %p632_p6 = scmp.lt.s32.totalorder %s172_s30, %s1142_s1 }
  0x5d   : > { %p630_p5 = scmp.ne.s32.totalorder %s172_s30, %s629_s7  ;;  %p633_p7 = scmp.lt.s32.totalorder %s996_s8, %s629_s7 }
  0x5f   : > { %p634_p9 = por %p633_p7, %p632_p6 }
  0x61   : > { %p635_p10 = pnand %p634_p9, %p630_p5 }
  0x63   : > { %638 = shalt.err (!%p635_p10)  }
  0x64   : > { %s639_s25 = scalar_lea.vmem %s1015_s29, 16  ;;  %p644_p12 = scmp.lt.s32.totalorder %s1015_s29, %s981_s13 }
  0x65   : > { %p640_p11 = scmp.ne.s32.totalorder %s1015_s29, %s639_s25  ;;  %p645_p13 = scmp.lt.s32.totalorder %s1005_s21, %s639_s25 }
  0x67   : > { %p646_p0 = por %p645_p13, %p644_p12 }
  0x69   : > { %p647_p1 = pnand %p646_p0, %p640_p11 }
  0x6b   : > { %650 = shalt.err (!%p647_p1)  }
  0x6c   : > { %185 = dma.hbm_to_vmem [thread:$0]  %s172_s30, 16, %s1015_s29, [#allocation3 + $0x2] }
  0x6d   : > { %s203_s28 = sadd.s32 4, %s973_s9  ;;  %s866_s6 = smov [#allocation2 + $0x3]  }
  0x6e   : > { %s199_s0 = sshll.u32 %s866_s6, 4  ;;  %s204_s5 = sld [smem:[#allocation5 + %s203_s28]]  ;;  %s200_s0 = int_to_ptr.vmem [resolvable:$true] %s199_s0 }
  0x6f   : > { %s867_s11 = smov [#allocation2 + $0x4]   ;;  %s220_s23 = sadd.s32 5, %s973_s9 }
  0x70   : > { %s216_s2 = sshll.u32 %s867_s11, 4  ;;  %s459_s7 = sshll.u32 %s187_s4, 4  ;;  %s1044_s2 = int_to_ptr.vmem [resolvable:$true] %s216_s2 }
  0x71   : > { %s189_s25 = scalar_lea.hbm %s1142_s1, %s459_s7  ;;  %s1049_s22 = sld [smem:[#allocation5 + %s220_s23]] }
  0x72   : > { %s651_s19 = scalar_lea.hbm %s189_s25, 16  ;;  %p654_p3 = scmp.lt.s32.totalorder %s189_s25, %s1142_s1 }
  0x73   : > { %p652_p2 = scmp.ne.s32.totalorder %s189_s25, %s651_s19  ;;  %p655_p5 = scmp.lt.s32.totalorder %s996_s8, %s651_s19 }
  0x75   : > { %p656_p6 = por %p655_p5, %p654_p3 }
  0x77   : > { %p657_p7 = pnand %p656_p6, %p652_p2 }
  0x79   : > { %660 = shalt.err (!%p657_p7)  }
  0x7a   : > { %s661_s28 = scalar_lea.vmem %s200_s0, 16  ;;  %p666_p10 = scmp.lt.s32.totalorder %s200_s0, %s981_s13 }
  0x7b   : > { %p662_p9 = scmp.ne.s32.totalorder %s200_s0, %s661_s28  ;;  %p667_p11 = scmp.lt.s32.totalorder %s1005_s21, %s661_s28 }
  0x7d   : > { %p668_p12 = por %p667_p11, %p666_p10 }
  0x7f   : > { %p669_p13 = pnand %p668_p12, %p662_p9 }
  0x81   : > { %672 = shalt.err (!%p669_p13)  }
  0x82   : > { %202 = dma.hbm_to_vmem [thread:$0]  %s189_s25, 16, %s200_s0, [#allocation3 + $0x3] }
  0x83   : > { %s460_s4 = sshll.u32 %s204_s5, 4  ;;  %s868_s19 = smov [#allocation2 + $0x5]  }
  0x84   : > { %s206_s23 = scalar_lea.hbm %s1142_s1, %s460_s4  ;;  %s233_s7 = sshll.u32 %s868_s19, 4  ;;  %s234_s7 = int_to_ptr.vmem [resolvable:$true] %s233_s7 }
  0x85   : > { %s673_s12 = scalar_lea.hbm %s206_s23, 16  ;;  %p676_p1 = scmp.lt.s32.totalorder %s206_s23, %s1142_s1 }
  0x86   : > { %p674_p0 = scmp.ne.s32.totalorder %s206_s23, %s673_s12  ;;  %p677_p2 = scmp.lt.s32.totalorder %s996_s8, %s673_s12 }
  0x88   : > { %p678_p3 = por %p677_p2, %p676_p1 }
  0x8a   : > { %p679_p5 = pnand %p678_p3, %p674_p0 }
  0x8c   : > { %682 = shalt.err (!%p679_p5)  }
  0x8d   : > { %s683_s0 = scalar_lea.vmem %s1044_s2, 16  ;;  %p688_p7 = scmp.lt.s32.totalorder %s1044_s2, %s981_s13 }
  0x8e   : > { %p684_p6 = scmp.ne.s32.totalorder %s1044_s2, %s683_s0  ;;  %p689_p9 = scmp.lt.s32.totalorder %s1005_s21, %s683_s0 }
  0x90   : > { %p690_p10 = por %p689_p9, %p688_p7 }
  0x92   : > { %p691_p11 = pnand %p690_p10, %p684_p6 }
  0x94   : > { %694 = shalt.err (!%p691_p11)  }
  0x95   : > { %219 = dma.hbm_to_vmem [thread:$0]  %s206_s23, 16, %s1044_s2, [#allocation3 + $0x4] }
  0x96   : > { %s237_s5 = sadd.s32 6, %s973_s9  ;;  %s461_s25 = sshll.u32 %s1049_s22, 4 }
  0x97   : > { %s238_s30 = sld [smem:[#allocation5 + %s237_s5]]  ;;  %s223_s6 = scalar_lea.hbm %s1142_s1, %s461_s25 }
  0x98   : > { %s695_s11 = scalar_lea.hbm %s223_s6, 16  ;;  %p698_p13 = scmp.lt.s32.totalorder %s223_s6, %s1142_s1 }
  0x99   : > { %p696_p12 = scmp.ne.s32.totalorder %s223_s6, %s695_s11  ;;  %p699_p0 = scmp.lt.s32.totalorder %s996_s8, %s695_s11 }
  0x9b   : > { %p700_p1 = por %p699_p0, %p698_p13 }
  0x9d   : > { %p701_p2 = pnand %p700_p1, %p696_p12 }
  0x9f   : > { %704 = shalt.err (!%p701_p2)  }
  0xa0   : > { %s705_s14 = scalar_lea.vmem %s234_s7, 16  ;;  %p710_p5 = scmp.lt.s32.totalorder %s234_s7, %s981_s13 }
  0xa1   : > { %p706_p3 = scmp.ne.s32.totalorder %s234_s7, %s705_s14  ;;  %p711_p6 = scmp.lt.s32.totalorder %s1005_s21, %s705_s14 }
  0xa3   : > { %p712_p7 = por %p711_p6, %p710_p5 }
  0xa5   : > { %p713_p9 = pnand %p712_p7, %p706_p3 }
  0xa7   : > { %716 = shalt.err (!%p713_p9)  }
  0xa8   : > { %236 = dma.hbm_to_vmem [thread:$0]  %s223_s6, 16, %s234_s7, [#allocation3 + $0x5] }
  0xa9   : > { %s869_s22 = smov [#allocation2 + $0x6]   ;;  %s254_s23 = sadd.s32 7, %s973_s9 }
  0xaa   : > { %s250_s2 = sshll.u32 %s869_s22, 4  ;;  %s255_s29 = sld [smem:[#allocation5 + %s254_s23]]  ;;  %s251_s2 = int_to_ptr.vmem [resolvable:$true] %s250_s2 }
  0xab   : > { %s462_s0 = sshll.u32 %s238_s30, 4  ;;  %s870_s5 = smov [#allocation2 + $0x7]  }
  0xac   : > { %s267_s25 = sshll.u32 %s870_s5, 4  ;;  %s240_s11 = scalar_lea.hbm %s1142_s1, %s462_s0  ;;  %s268_s25 = int_to_ptr.vmem [resolvable:$true] %s267_s25 }
  0xad   : > { %s717_s19 = scalar_lea.hbm %s240_s11, 16  ;;  %p720_p11 = scmp.lt.s32.totalorder %s240_s11, %s1142_s1 }
  0xae   : > { %p718_p10 = scmp.ne.s32.totalorder %s240_s11, %s717_s19  ;;  %p721_p12 = scmp.lt.s32.totalorder %s996_s8, %s717_s19 }
  0xb0   : > { %p722_p13 = por %p721_p12, %p720_p11 }
  0xb2   : > { %p723_p0 = pnand %p722_p13, %p718_p10 }
  0xb4   : > { %726 = shalt.err (!%p723_p0)  }
  0xb5   : > { %s727_s9 = scalar_lea.vmem %s251_s2, 16  ;;  %p732_p2 = scmp.lt.s32.totalorder %s251_s2, %s981_s13 }
  0xb6   : > { %p728_p1 = scmp.ne.s32.totalorder %s251_s2, %s727_s9  ;;  %p733_p3 = scmp.lt.s32.totalorder %s1005_s21, %s727_s9 }
  0xb8   : > { %p734_p5 = por %p733_p3, %p732_p2 }
  0xba   : > { %p735_p6 = pnand %p734_p5, %p728_p1 }
  0xbc   : > { %738 = shalt.err (!%p735_p6)  }
  0xbd   : > { %253 = dma.hbm_to_vmem [thread:$0]  %s240_s11, 16, %s251_s2, [#allocation3 + $0x6] }
  0xbe   : > { %s463_s7 = sshll.u32 %s255_s29, 4 }
  0xbf   : > { %s257_s22 = scalar_lea.hbm %s1142_s1, %s463_s7 }
  0xc0   : > { %s739_s23 = scalar_lea.hbm %s257_s22, 16  ;;  %p742_p9 = scmp.lt.s32.totalorder %s257_s22, %s1142_s1 }
  0xc1   : > { %p740_p7 = scmp.ne.s32.totalorder %s257_s22, %s739_s23  ;;  %p743_p10 = scmp.lt.s32.totalorder %s996_s8, %s739_s23 }
  0xc3   : > { %p744_p11 = por %p743_p10, %p742_p9 }
  0xc5   : > { %p745_p12 = pnand %p744_p11, %p740_p7 }
  0xc7   : > { %748 = shalt.err (!%p745_p12)  }
  0xc8   : > { %s749_s28 = scalar_lea.vmem %s268_s25, 16  ;;  %p754_p0 = scmp.lt.s32.totalorder %s268_s25, %s981_s13 }
  0xc9   : > { %p750_p13 = scmp.ne.s32.totalorder %s268_s25, %s749_s28  ;;  %p755_p1 = scmp.lt.s32.totalorder %s1005_s21, %s749_s28 }
  0xcb   : > { %p756_p2 = por %p755_p1, %p754_p0 }
  0xcd   : > { %p757_p3 = pnand %p756_p2, %p750_p13 }
  0xcf   : > { %760 = shalt.err (!%p757_p3)  }
  0xd0   : > { %270 = dma.hbm_to_vmem [thread:$0]  %s257_s22, 16, %s268_s25, [#allocation3 + $0x7] }
  0xd1   : > { %s134_s2 = scalar_lea.vmem [#allocation9], %s977_s10 }
  0xd2   : > { %817 = dma.done.wait [#allocation3], 16 }
  0xd3   : > { %818 = vsyncadd [#allocation3], 4294967280 }
  0xd4   : > { %819 = dma.done.wait [#allocation3 + $0x1], 16 }
  0xd5   : > { %820 = vsyncadd [#allocation3 + $0x1], 4294967280 }
  0xd6   : > { %821 = dma.done.wait [#allocation3 + $0x2], 16 }
  0xd7   : > { %822 = vsyncadd [#allocation3 + $0x2], 4294967280 }
  0xd8   : > { %823 = dma.done.wait [#allocation3 + $0x3], 16 }
  0xd9   : > { %824 = vsyncadd [#allocation3 + $0x3], 4294967280 }
  0xda   : > { %825 = dma.done.wait [#allocation3 + $0x4], 16 }
  0xdb   : > { %826 = vsyncadd [#allocation3 + $0x4], 4294967280 }
  0xdc   : > { %827 = dma.done.wait [#allocation3 + $0x5], 16 }
  0xdd   : > { %828 = vsyncadd [#allocation3 + $0x5], 4294967280 }
  0xde   : > { %829 = dma.done.wait [#allocation3 + $0x6], 16 }
  0xdf   : > { %830 = vsyncadd [#allocation3 + $0x6], 4294967280 }
  0xe0   : > { %831 = dma.done.wait [#allocation3 + $0x7], 16 }
  0xe1   : > { %832 = vsyncadd [#allocation3 + $0x7], 4294967280  ;;  %s465_s8 = sshll.u32 %s851_s18, 7  ;;  %s307_s10 = sshll.u32 %s134_s2, 4  ;;  %v288_v0 = vld [vmem:[#allocation2] sm:$0xff]  ;;  %v289_v1 = vld [vmem:[#allocation6] sm:$0xff]  ;;  %s308_s10 = int_to_ptr.vmem [resolvable:$true] %s307_s10 }
  0xe2   : > { %v290_v2 = vadd.f32 %v289_v1, %v288_v0  ;;  %s305_s29 = scalar_lea.hbm %s1144_s3, %s465_s8  ;;  %s1156_s25 = sand.u32 1, %s843_s16  }
  0xe3   : > { %s293_s4 = scalar_lea.sflag [#allocation8], %s1156_s25  ;;  %s761_s11 = scalar_lea.vmem %s308_s10, 128 }
  0xe4   : > { %291 = vst [vmem:[%s134_s2] sm:$0xff] %v290_v2  ;;  %p762_p5 = scmp.ne.s32.totalorder %s308_s10, %s761_s11  ;;  %s871_s19 = smov [#allocation9]  }
  0xe5   : > { %s765_s12 = sshll.u32 %s871_s19, 4  ;;  %s766_s12 = int_to_ptr.vmem [resolvable:$false] %s765_s12 }
  0xe6   : > { %p763_p6 = pnand %p762_p5, %p935_p4  ;;  %s767_s18 = scalar_lea.vmem %s766_s12, 256 }
  0xe7   : > { %p768_p9 = scmp.lt.s32.totalorder %s308_s10, %s766_s12  ;;  %p769_p10 = scmp.lt.s32.totalorder %s767_s18, %s761_s11 }
  0xe8   : > { %p764_p7 = pneg %p763_p6 }
  0xe9   : > { %p770_p11 = por %p769_p10, %p768_p9 }
  0xeb   : > { %p771_p12 = pnand %p770_p11, %p764_p7 }
  0xed   : > { %774 = shalt.err (!%p771_p12)
}
  0xee   : > { %s775_s14 = scalar_lea.hbm %s305_s29, 128  ;;  %s779_s30 = scalar_lea.hbm %s1144_s3, 256 }
  0xef   : > { %p776_p13 = scmp.ne.s32.totalorder %s305_s29, %s775_s14  ;;  %p780_p2 = scmp.lt.s32.totalorder %s305_s29, %s1144_s3 }
  0xf0   : > { %p781_p3 = scmp.lt.s32.totalorder %s779_s30, %s775_s14 }
  0xf1   : > { %p777_p0 = pnand %p776_p13, %p935_p4 }
  0xf2   : > { %p782_p5 = por %p781_p3, %p780_p2 }
  0xf3   : > { %p778_p1 = pneg %p777_p0 }
  0xf5   : > { %p783_p6 = pnand %p782_p5, %p778_p1 }
  0xf7   : > { %786 = shalt.err (!%p783_p6)
}
  0xf8   : > { %480 = dma.vmem_to_hbm [thread:$0]  (%p935_p4), %s308_s10, 128, %s305_s29, %s293_s4  }
  0xf9 PF: > { %p492_p7 = scmp.ge.s32.totalorder %s859_s20, 2  ;;  %s319_s23 = sand.u32 1, %s839_s15  }
  0xfa   : > { %s320_s0 = scalar_lea.sflag [#allocation8], %s319_s23 }
  0xfb   : > { %p487_p9 = pnand %p492_p7, %p942_p8 }
  0xfd   : > { %p488_p10 = pneg %p487_p9 }
  0xff   : > { %834 = dma.done.wait (%p488_p10), %s320_s0, 128  }
 0x100   : > { %836 = vsyncadd (%p488_p10), %s320_s0, 4294967168  ;;  %s21_s20 = sadd.s32 1, %s859_s20   ;;  %s1157_s18 = sld [smem:[#allocation39_spill]] }
 0x101   : > { %p18_p11 = scmp.ge.s32.totalorder %s21_s20, 4   ;;  %s1158_s19 = sld [smem:[#allocation40_spill]] }
 0x102   : > { %s1159_s15 = smov %s843_s16  ;;  %s1160_s16 = smov %s847_s17 }
 0x103   : > { %s1161_s17 = smov %s948_s27  ;;  %20 = sbr.rel (!%p18_p11) target bundleno = 11 (0xb), region = 123 }
 0x108   :  { %325 = vsyncpa [#allocation7], 1 }
 0x109   :  { %327 = vsyncpa [#allocation7 + $0x1], 1 }
 0x10a   :  { %328 = vsyncpa [#allocation8], 1 }
 0x10b   :  { %330 = vsyncpa [#allocation8 + $0x1], 1 }
 0x10c   :  { %331 = vsyncmov [#allocation3] }
 0x10f   :  { %s332_s24 = vpop.sfrf %331 }
 0x110   :  { %p468_p4 = scmp.ne.s32.totalorder %s332_s24, 0 }
 0x112   :  { %336 = shalt.err (%p468_p4)  }
 0x113   :  { %338 = vsyncmov [#allocation3 + $0x1] }
 0x116   :  { %s339_s26 = vpop.sfrf %338 }
 0x117   :  { %p469_p8 = scmp.ne.s32.totalorder %s339_s26, 0 }
 0x119   :  { %343 = shalt.err (%p469_p8)  }
 0x11a   :  { %345 = vsyncmov [#allocation3 + $0x2] }
 0x11d   :  { %s346_s27 = vpop.sfrf %345 }
 0x11e   :  { %p470_p12 = scmp.ne.s32.totalorder %s346_s27, 0 }
 0x120   :  { %350 = shalt.err (%p470_p12)  }
 0x121   :  { %352 = vsyncmov [#allocation3 + $0x3] }
 0x124   :  { %s353_s5 = vpop.sfrf %352 }
 0x125   :  { %p471_p13 = scmp.ne.s32.totalorder %s353_s5, 0 }
 0x127   :  { %357 = shalt.err (%p471_p13)  }
 0x128   :  { %359 = vsyncmov [#allocation3 + $0x4] }
 0x12b   :  { %s360_s1 = vpop.sfrf %359 }
 0x12c   :  { %p472_p0 = scmp.ne.s32.totalorder %s360_s1, 0 }
 0x12e   :  { %364 = shalt.err (%p472_p0)  }
 0x12f   :  { %366 = vsyncmov [#allocation3 + $0x5] }
 0x132   :  { %s367_s3 = vpop.sfrf %366 }
 0x133   :  { %p473_p1 = scmp.ne.s32.totalorder %s367_s3, 0 }
 0x135   :  { %371 = shalt.err (%p473_p1)  }
 0x136   :  { %373 = vsyncmov [#allocation3 + $0x6] }
 0x139   :  { %s374_s15 = vpop.sfrf %373 }
 0x13a   :  { %p474_p2 = scmp.ne.s32.totalorder %s374_s15, 0 }
 0x13c   :  { %378 = shalt.err (%p474_p2)  }
 0x13d   :  { %380 = vsyncmov [#allocation3 + $0x7] }
 0x140   :  { %s381_s16 = vpop.sfrf %380 }
 0x141   :  { %p475_p3 = scmp.ne.s32.totalorder %s381_s16, 0 }
 0x143   :  { %385 = shalt.err (%p475_p3)  }

</bundles_post_ra>
